<compile_context>
chip_gen: v7x
topology: tpu7x:2x2x1
jax: 0.10.0
libtpu: 0.0.40
codegen_flags: <defaults>
</compile_context>

<pallas_src>
import functools

import jax
import jax.numpy as jnp
from jax.experimental import pallas as pl
from jax.experimental.pallas import tpu as pltpu


# ----------------------------------------------------------------------------
# Kernels
# ----------------------------------------------------------------------------

def _fused_kernel(x_ref, w1t_ref, b1_ref, wht_ref, bh_ref, wwt_ref, bw_ref,
                  o_ref):
    """Whole-image block: pooling + gates + gated store in one pass.

    x_ref block: (BB, H, W, C) — C on lanes, W on sublanes.
    Weights are pre-transposed on the host: w1t (C, Ci), wht/wwt (Ci, C).
    """
    x = x_ref[...]                                   # original dtype, no f32 slab copy
    BB, H, W, C = x.shape

    # --- coordinate pooling, f32 accumulation only ---------------------------
    z_h = jnp.mean(x, axis=2, dtype=jnp.float32)     # (BB, H, C)  mean over W
    z_w = jnp.mean(x, axis=1, dtype=jnp.float32)     # (BB, W, C)  mean over H

    # --- F1 (BN folded) + ReLU6: 2-D MXU matmuls on row-stacked pools --------
    rows_h = BB * H
    rows_w = BB * W
    if rows_h % 8 == 0:
        # Row-stack the two pooled tensors -> a single F1 matmul (split is
        # sublane-aligned because rows_h % 8 == 0).
        z = jnp.concatenate(
            [z_h.reshape(rows_h, C), z_w.reshape(rows_w, C)], axis=0)
        y = jnp.clip(
            jnp.dot(z, w1t_ref[...], preferred_element_type=jnp.float32)
            + b1_ref[...], 0.0, 6.0)
        y_h, y_w = y[:rows_h], y[rows_h:]
    else:
        y_h = jnp.clip(
            jnp.dot(z_h.reshape(rows_h, C), w1t_ref[...],
                    preferred_element_type=jnp.float32) + b1_ref[...], 0.0, 6.0)
        y_w = jnp.clip(
            jnp.dot(z_w.reshape(rows_w, C), w1t_ref[...],
                    preferred_element_type=jnp.float32) + b1_ref[...], 0.0, 6.0)

    # --- Fh / Fw + sigmoid gates ----------------------------------------------
    g_h = jax.nn.sigmoid(
        jnp.dot(y_h, wht_ref[...], preferred_element_type=jnp.float32)
        + bh_ref[...]).reshape(BB, H, C)
    g_w = jax.nn.sigmoid(
        jnp.dot(y_w, wwt_ref[...], preferred_element_type=jnp.float32)
        + bw_ref[...]).reshape(BB, W, C)

    # --- gated output ---------------------------------------------------------
    # 16-bit inputs: multiply in the input dtype (bf16 VALU on v6e/v7x halves
    # staging + vst traffic).  f32 inputs (and v5e-preferred path) stay f32.
    if jnp.dtype(x.dtype).itemsize <= 2:
        g_h = g_h.astype(x.dtype)
        g_w = g_w.astype(x.dtype)
    o_ref[...] = (x * g_h[:, :, None, :] * g_w[:, None, :, :]).astype(o_ref.dtype)


def _gate_kernel(x_ref, w1t_ref, b1_ref, wht_ref, bh_ref, wwt_ref, bw_ref,
                 gh_ref, gw_ref, zw_acc, *, h_total):
    """Split path, stage 1: H-tiled pooling + tiny matmuls + sigmoid gates.

    grid = (B, H // th), semantics ("parallel", "arbitrary").
    x_ref  block: (1, th, W, C)
    gh_ref block: (1, th, 1, C)  — written every step
    gw_ref block: (1, 1, W, C)   — resident; written on the last H step
    zw_acc scratch: (W, C) f32   — running sum over H
    """
    h = pl.program_id(1)
    x = x_ref[0]                                     # (th, W, C)

    @pl.when(h == 0)
    def _init():
        zw_acc[...] = jnp.zeros_like(zw_acc)

    zw_acc[...] += jnp.sum(x, axis=0, dtype=jnp.float32)          # (W, C)

    # Per-tile g_h rows (1x1 convs act row-wise, so tiles are independent).
    z_h = jnp.mean(x, axis=1, dtype=jnp.float32)                  # (th, C)
    y_h = jnp.clip(
        jnp.dot(z_h, w1t_ref[...], preferred_element_type=jnp.float32)
        + b1_ref[...], 0.0, 6.0)
    g_h = jax.nn.sigmoid(
        jnp.dot(y_h, wht_ref[...], preferred_element_type=jnp.float32)
        + bh_ref[...])
    gh_ref[0] = g_h[:, None, :].astype(gh_ref.dtype)

    @pl.when(h == pl.num_programs(1) - 1)
    def _finalize():
        z_w = zw_acc[...] * (1.0 / h_total)                       # (W, C)
        y_w = jnp.clip(
            jnp.dot(z_w, w1t_ref[...], preferred_element_type=jnp.float32)
            + b1_ref[...], 0.0, 6.0)
        g_w = jax.nn.sigmoid(
            jnp.dot(y_w, wwt_ref[...], preferred_element_type=jnp.float32)
            + bw_ref[...])
        gw_ref[0] = g_w[None, :, :].astype(gw_ref.dtype)


def _apply_kernel(x_ref, gh_ref, gw_ref, o_ref):
    """Split path, stage 2: out = x * g_h * g_w, H-tiled, fully parallel grid."""
    x = x_ref[0]                                     # (th, W, C)
    o_ref[0] = (x * gh_ref[0] * gw_ref[0]).astype(o_ref.dtype)


# ----------------------------------------------------------------------------
# VMEM budgeting / tiling policy
# ----------------------------------------------------------------------------

def _vmem_capacity_bytes():
    try:
        return int(pltpu.get_tpu_info().vmem_capacity_bytes)
    except Exception:
        return 64 << 20      # conservative fallback: v7x per-TensorCore VMEM


def _pad8(n):
    return -(-n // 8) * 8


def _pad128(n):
    return -(-n // 128) * 128


def _fused_footprint_bytes(bb, H, W, C, itemsize):
    """Honest per-step VMEM model for the fused kernel: double-buffered in +
    out slabs (input dtype), the live gated-product temp, and one f32-slab
    allowance for compiler temporaries (pooling convert, gate broadcasts)."""
    elems = H * _pad8(W) * _pad128(C)
    gate_itemsize = itemsize if itemsize <= 2 else 4
    return bb * elems * (4 * itemsize + gate_itemsize + 4)


def _tile_footprint_bytes(th, W, C, itemsize):
    """Per-step VMEM model for the split-path apply kernel (larger of the two)."""
    elems = th * _pad8(W) * _pad128(C)
    gate_itemsize = itemsize if itemsize <= 2 else 4
    return elems * (4 * itemsize + gate_itemsize + 4)


def _choose_block_batch(B, H, W, C, itemsize, budget):
    divisors = [d for d in range(1, B + 1) if B % d == 0]
    fitting = [d for d in divisors
               if _fused_footprint_bytes(d, H, W, C, itemsize) <= budget]
    if not fitting:
        return None
    bb = max(fitting)
    # Keep >= 2 grid steps when possible so both v7x TensorCores get work.
    if B >= 2 and B // bb < 2:
        smaller = [d for d in fitting if B // d >= 2]
        if smaller:
            bb = max(smaller)
    return bb


def _choose_h_tile(B, H, W, C, itemsize, budget):
    divisors = [d for d in range(1, H + 1) if H % d == 0]
    fitting = [d for d in divisors
               if _tile_footprint_bytes(d, W, C, itemsize) <= budget]
    if not fitting:
        return None
    th = max(fitting)
    # Prefer >= 2 total grid steps (megacore) when possible.
    if B * (H // th) < 2:
        smaller = [d for d in fitting if B * (H // d) >= 2]
        if smaller:
            th = max(smaller)
    return th


# ----------------------------------------------------------------------------
# Wrappers
# ----------------------------------------------------------------------------

def coordinate_attention_nhwc(x, w1, b1, wh, bh, ww, bw):
    """x: (B, H, W, C).  w1:(Ci,C) b1:(Ci,) wh/ww:(C,Ci) bh/bw:(C,)."""
    B, H, W, C = x.shape
    Ci = w1.shape[0]
    itemsize = jnp.dtype(x.dtype).itemsize
    gate_dtype = x.dtype if itemsize <= 2 else jnp.float32

    cap = _vmem_capacity_bytes()
    # Generation-aware slab budget: ~70% of per-core VMEM (v5e/v6e: 128 MiB,
    # v7x: 64 MiB), capped so weights / gate blocks / compiler scratch fit.
    budget = min(int(cap * 0.70), 96 << 20)

    # Pre-transposed f32 weights -> plain 2-D MXU matmuls inside the kernels.
    w1t = jnp.transpose(w1).astype(jnp.float32)        # (C, Ci)
    wht = jnp.transpose(wh).astype(jnp.float32)        # (Ci, C)
    wwt = jnp.transpose(ww).astype(jnp.float32)        # (Ci, C)
    b1_2d = b1.reshape(1, Ci).astype(jnp.float32)
    bh_2d = bh.reshape(1, C).astype(jnp.float32)
    bw_2d = bw.reshape(1, C).astype(jnp.float32)

    weight_specs = [
        pl.BlockSpec((C, Ci), lambda *_: (0, 0)),
        pl.BlockSpec((1, Ci), lambda *_: (0, 0)),
        pl.BlockSpec((Ci, C), lambda *_: (0, 0)),
        pl.BlockSpec((1, C), lambda *_: (0, 0)),
        pl.BlockSpec((Ci, C), lambda *_: (0, 0)),
        pl.BlockSpec((1, C), lambda *_: (0, 0)),
    ]
    weight_args = (w1t, b1_2d, wht, bh_2d, wwt, bw_2d)

    bb = _choose_block_batch(B, H, W, C, itemsize, budget)
    use_split = bb is None
    if not use_split and B == 1:
        # With one batch the fused grid has a single step: one v7x TensorCore
        # would idle.  Prefer the H-tiled split path when H tiles >= 2.
        th_probe = _choose_h_tile(B, H, W, C, itemsize, budget)
        if th_probe is not None and H // th_probe >= 2:
            use_split = True

    if not use_split:
        # ------------------------------ fused path ---------------------------
        footprint = _fused_footprint_bytes(bb, H, W, C, itemsize)
        vmem_limit = int(min(max(footprint + (4 << 20), 32 << 20),
                             cap - (4 << 20)))
        return pl.pallas_call(
            _fused_kernel,
            out_shape=jax.ShapeDtypeStruct((B, H, W, C), x.dtype),
            grid_spec=pltpu.PrefetchScalarGridSpec(
                num_scalar_prefetch=0,
                grid=(B // bb,),
                in_specs=[pl.BlockSpec((bb, H, W, C),
                                       lambda b: (b, 0, 0, 0))] + weight_specs,
                out_specs=pl.BlockSpec((bb, H, W, C), lambda b: (b, 0, 0, 0)),
            ),
            compiler_params=pltpu.CompilerParams(
                dimension_semantics=("parallel",),
                vmem_limit_bytes=vmem_limit),
        )(x, *weight_args)

    # -------------------------------- split path -----------------------------
    th = _choose_h_tile(B, H, W, C, itemsize, budget)
    if th is None:
        # TODO(synk): even a single-row H tile exceeds the VMEM budget (huge
        # W*C); would additionally need W- or C-tiling.  Fall back to th = H.
        th = H
    n_h = H // th
    tile_fp = _tile_footprint_bytes(th, W, C, itemsize)
    vmem_limit = int(min(max(tile_fp + (4 << 20), 32 << 20), cap - (4 << 20)))

    g_h, g_w = pl.pallas_call(
        functools.partial(_gate_kernel, h_total=H),
        out_shape=(jax.ShapeDtypeStruct((B, H, 1, C), gate_dtype),
                   jax.ShapeDtypeStruct((B, 1, W, C), gate_dtype)),
        grid_spec=pltpu.PrefetchScalarGridSpec(
            num_scalar_prefetch=0,
            grid=(B, n_h),
            in_specs=[pl.BlockSpec((1, th, W, C),
                                   lambda b, h: (b, h, 0, 0))] + weight_specs,
            out_specs=[pl.BlockSpec((1, th, 1, C), lambda b, h: (b, h, 0, 0)),
                       pl.BlockSpec((1, 1, W, C), lambda b, h: (b, 0, 0, 0))],
            scratch_shapes=[pltpu.VMEM((W, C), jnp.float32)],
        ),
        compiler_params=pltpu.CompilerParams(
            dimension_semantics=("parallel", "arbitrary"),
            vmem_limit_bytes=vmem_limit),
    )(x, *weight_args)

    return pl.pallas_call(
        _apply_kernel,
        out_shape=jax.ShapeDtypeStruct((B, H, W, C), x.dtype),
        grid_spec=pltpu.PrefetchScalarGridSpec(
            num_scalar_prefetch=0,
            grid=(B, n_h),
            in_specs=[pl.BlockSpec((1, th, W, C), lambda b, h: (b, h, 0, 0)),
                      pl.BlockSpec((1, th, 1, C), lambda b, h: (b, h, 0, 0)),
                      pl.BlockSpec((1, 1, W, C), lambda b, h: (b, 0, 0, 0))],
            out_specs=pl.BlockSpec((1, th, W, C), lambda b, h: (b, h, 0, 0)),
        ),
        compiler_params=pltpu.CompilerParams(
            dimension_semantics=("parallel", "parallel"),
            vmem_limit_bytes=vmem_limit),
    )(x, g_h, g_w)


@jax.jit
def coordinate_attention(x_nchw, w1, b1, wh, bh, ww, bw):
    """NCHW entry (PyTorch layout).  Transposes to NHWC for the lane-dense
    kernels; call coordinate_attention_nhwc directly if the surrounding model
    is already NHWC."""
    x_nhwc = jnp.transpose(x_nchw, (0, 2, 3, 1))
    out = coordinate_attention_nhwc(x_nhwc, w1, b1, wh, bh, ww, bw)
    return jnp.transpose(out, (0, 3, 1, 2))


# ----------------------------------------------------------------------------
# Parameters & pure-JAX reference
# ----------------------------------------------------------------------------

def make_params(in_channels, reduction_ratio=32, seed=0):
    """Deterministic synthetic parameters (matching nn.Module __init__ shapes),
    with eval-mode BatchNorm folded into the F1 conv."""
    inter = max(8, in_channels // reduction_ratio)
    keys = jax.random.split(jax.random.PRNGKey(seed), 6)
    w1 = jax.random.normal(keys[0], (inter, in_channels), jnp.float32) * 0.1
    b1 = jax.random.normal(keys[1], (inter,), jnp.float32) * 0.1
    wh = jax.random.normal(keys[2], (in_channels, inter), jnp.float32) * 0.1
    bh = jax.random.normal(keys[3], (in_channels,), jnp.float32) * 0.1
    ww = jax.random.normal(keys[4], (in_channels, inter), jnp.float32) * 0.1
    bw = jax.random.normal(keys[5], (in_channels,), jnp.float32) * 0.1

    # Fold BatchNorm (eval mode, default running stats) into the F1 conv.
    gamma = jnp.ones((inter,), jnp.float32)
    beta = jnp.zeros((inter,), jnp.float32)
    running_mean = jnp.zeros((inter,), jnp.float32)
    running_var = jnp.ones((inter,), jnp.float32)
    eps = 1e-5
    scale = gamma / jnp.sqrt(running_var + eps)
    w1_eff = w1 * scale[:, None]
    b1_eff = (b1 - running_mean) * scale + beta
    return w1_eff, b1_eff, wh, bh, ww, bw


def reference_forward(x, w1, b1, wh, bh, ww, bw):
    """Pure-JAX NCHW reference (intended semantics of the PyTorch module)."""
    z_h = jnp.mean(x, axis=3)                                   # (B, C, H)
    z_w = jnp.mean(x, axis=2)                                   # (B, C, W)
    y_h = jnp.clip(jnp.einsum('ic,bch->bih', w1, z_h)
                   + b1[None, :, None], 0.0, 6.0)
    y_w = jnp.clip(jnp.einsum('ic,bcw->biw', w1, z_w)
                   + b1[None, :, None], 0.0, 6.0)
    g_h = jax.nn.sigmoid(jnp.einsum('ci,bih->bch', wh, y_h) + bh[None, :, None])
    g_w = jax.nn.sigmoid(jnp.einsum('ci,biw->bcw', ww, y_w) + bw[None, :, None])
    return x * g_h[:, :, :, None] * g_w[:, :, None, :]


# ----------------------------------------------------------------------------
# Smoke test
# ----------------------------------------------------------------------------

if __name__ == "__main__":
    tests = [
        # (B, C, H, W, dtype, atol, rtol)
        (2, 4, 16, 16, jnp.float32, 1e-5, 1e-5),     # tiny general path (C < 128)
        (2, 128, 16, 16, jnp.float32, 1e-5, 1e-5),   # lane-dense fused path
        (1, 128, 32, 16, jnp.float32, 1e-5, 1e-5),   # B=1 -> H-tiled split path
        (2, 128, 16, 16, jnp.bfloat16, 5e-2, 5e-2),  # bf16 gating path
    ]
    for (B, C, H, W, dtype, atol, rtol) in tests:
        key = jax.random.PRNGKey(0)
        x = jax.random.normal(key, (B, C, H, W), jnp.float32)
        params = make_params(C, reduction_ratio=32, seed=0)

        xk = x.astype(dtype)
        out = coordinate_attention(xk, *params)
        out = jax.block_until_ready(out)

        ref = reference_forward(xk.astype(jnp.float32), *params)
        assert out.shape == (B, C, H, W)
        assert out.dtype == dtype
        ok = jnp.allclose(out.astype(jnp.float32), ref, atol=atol, rtol=rtol)
        assert bool(ok), f"mismatch vs reference for shape {(B, C, H, W)} {dtype}"

    print("KERNEL_OK")
</pallas_src>

<mosaic_0001>
module attributes {stable_mosaic.version = 11 : i64} {
  func.func @_fused_kernel(%arg0: i32, %arg1: memref<1x16x16x4xf32, #tpu.memory_space<vmem>>, %arg2: memref<4x8xf32, #tpu.memory_space<vmem>>, %arg3: memref<1x8xf32, #tpu.memory_space<vmem>>, %arg4: memref<8x4xf32, #tpu.memory_space<vmem>>, %arg5: memref<1x4xf32, #tpu.memory_space<vmem>>, %arg6: memref<8x4xf32, #tpu.memory_space<vmem>>, %arg7: memref<1x4xf32, #tpu.memory_space<vmem>>, %arg8: memref<1x16x16x4xf32, #tpu.memory_space<vmem>>) attributes {dimension_semantics = [#tpu.dimension_semantics<parallel>], iteration_bounds = array<i64: 2>, scalar_prefetch = 0 : i64, scratch_operands = 0 : i64, tpu.core_type = #tpu.core_type<tc>, window_params = [{transform_indices = @transform_0, window_bounds = array<i64: 1, 16, 16, 4>}, {pipeline_mode = #tpu.pipeline_mode<synchronous>, transform_indices = @transform_1, window_bounds = array<i64: 4, 8>}, {pipeline_mode = #tpu.pipeline_mode<synchronous>, transform_indices = @transform_2, window_bounds = array<i64: 1, 8>}, {pipeline_mode = #tpu.pipeline_mode<synchronous>, transform_indices = @transform_3, window_bounds = array<i64: 8, 4>}, {pipeline_mode = #tpu.pipeline_mode<synchronous>, transform_indices = @transform_4, window_bounds = array<i64: 1, 4>}, {pipeline_mode = #tpu.pipeline_mode<synchronous>, transform_indices = @transform_5, window_bounds = array<i64: 8, 4>}, {pipeline_mode = #tpu.pipeline_mode<synchronous>, transform_indices = @transform_6, window_bounds = array<i64: 1, 4>}, {transform_indices = @transform_7, window_bounds = array<i64: 1, 16, 16, 4>}]} {
    %c0 = arith.constant 0 : index
    %c0_0 = arith.constant 0 : index
    %c0_1 = arith.constant 0 : index
    %c0_2 = arith.constant 0 : index
    %0 = vector.load %arg1[%c0, %c0_0, %c0_1, %c0_2] : memref<1x16x16x4xf32, #tpu.memory_space<vmem>>, vector<1x16x16x4xf32>
    %cst = arith.constant dense<0.000000e+00> : vector<1x16x4xf32>
    %1 = vector.multi_reduction <add>, %0, %cst [2] : vector<1x16x16x4xf32> to vector<1x16x4xf32>
    %cst_3 = arith.constant 1.600000e+01 : f32
    %2 = vector.broadcast %cst_3 : f32 to vector<1x16x4xf32>
    %3 = arith.divf %1, %2 : vector<1x16x4xf32>
    %cst_4 = arith.constant dense<0.000000e+00> : vector<1x16x4xf32>
    %4 = vector.multi_reduction <add>, %0, %cst_4 [1] : vector<1x16x16x4xf32> to vector<1x16x4xf32>
    %cst_5 = arith.constant 1.600000e+01 : f32
    %5 = vector.broadcast %cst_5 : f32 to vector<1x16x4xf32>
    %6 = arith.divf %4, %5 : vector<1x16x4xf32>
    %7 = vector.shape_cast %3 : vector<1x16x4xf32> to vector<16x4xf32>
    %8 = vector.shape_cast %6 : vector<1x16x4xf32> to vector<16x4xf32>
    %9 = tpu.concatenate %7, %8 in 0 : vector<16x4xf32>, vector<16x4xf32> -> vector<32x4xf32>
    %c0_6 = arith.constant 0 : index
    %c0_7 = arith.constant 0 : index
    %10 = vector.load %arg2[%c0_6, %c0_7] : memref<4x8xf32, #tpu.memory_space<vmem>>, vector<4x8xf32>
    %cst_8 = arith.constant dense<0.000000e+00> : vector<32x8xf32>
    %11 = tpu.matmul %9, %10, %cst_8 {dimension_numbers = #tpu.dot_dimension_numbers<[1], [0], [0], [1], [0, 0, 1, 1], [], []>} : vector<32x4xf32>, vector<4x8xf32>, vector<32x8xf32> -> vector<32x8xf32>
    %c0_9 = arith.constant 0 : index
    %c0_10 = arith.constant 0 : index
    %12 = vector.load %arg3[%c0_9, %c0_10] : memref<1x8xf32, #tpu.memory_space<vmem>>, vector<1x8xf32>
    %13 = vector.broadcast %12 : vector<1x8xf32> to vector<32x8xf32>
    %14 = arith.addf %11, %13 : vector<32x8xf32>
    %cst_11 = arith.constant 0.000000e+00 : f32
    %cst_12 = arith.constant 6.000000e+00 : f32
    %15 = vector.broadcast %cst_11 : f32 to vector<32x8xf32>
    %16 = arith.maximumf %15, %14 : vector<32x8xf32>
    %17 = vector.broadcast %cst_12 : f32 to vector<32x8xf32>
    %18 = arith.minimumf %17, %16 : vector<32x8xf32>
    %19 = vector.extract_strided_slice %18 {offsets = [0, 0], sizes = [16, 8], strides = [1, 1]} : vector<32x8xf32> to vector<16x8xf32>
    %20 = vector.extract_strided_slice %18 {offsets = [16, 0], sizes = [16, 8], strides = [1, 1]} : vector<32x8xf32> to vector<16x8xf32>
    %c0_13 = arith.constant 0 : index
    %c0_14 = arith.constant 0 : index
    %21 = vector.load %arg4[%c0_13, %c0_14] : memref<8x4xf32, #tpu.memory_space<vmem>>, vector<8x4xf32>
    %cst_15 = arith.constant dense<0.000000e+00> : vector<16x4xf32>
    %22 = tpu.matmul %19, %21, %cst_15 {dimension_numbers = #tpu.dot_dimension_numbers<[1], [0], [0], [1], [0, 0, 1, 1], [], []>} : vector<16x8xf32>, vector<8x4xf32>, vector<16x4xf32> -> vector<16x4xf32>
    %c0_16 = arith.constant 0 : index
    %c0_17 = arith.constant 0 : index
    %23 = vector.load %arg5[%c0_16, %c0_17] : memref<1x4xf32, #tpu.memory_space<vmem>>, vector<1x4xf32>
    %24 = vector.broadcast %23 : vector<1x4xf32> to vector<16x4xf32>
    %25 = arith.addf %22, %24 : vector<16x4xf32>
    %26 = arith.negf %25 : vector<16x4xf32>
    %27 = math.exp %26 : vector<16x4xf32>
    %cst_18 = arith.constant 1.000000e+00 : f32
    %28 = vector.broadcast %cst_18 : f32 to vector<16x4xf32>
    %29 = arith.addf %28, %27 : vector<16x4xf32>
    %30 = arith.divf %28, %29 : vector<16x4xf32>
    %31 = vector.shape_cast %30 : vector<16x4xf32> to vector<1x16x4xf32>
    %c0_19 = arith.constant 0 : index
    %c0_20 = arith.constant 0 : index
    %32 = vector.load %arg6[%c0_19, %c0_20] : memref<8x4xf32, #tpu.memory_space<vmem>>, vector<8x4xf32>
    %cst_21 = arith.constant dense<0.000000e+00> : vector<16x4xf32>
    %33 = tpu.matmul %20, %32, %cst_21 {dimension_numbers = #tpu.dot_dimension_numbers<[1], [0], [0], [1], [0, 0, 1, 1], [], []>} : vector<16x8xf32>, vector<8x4xf32>, vector<16x4xf32> -> vector<16x4xf32>
    %c0_22 = arith.constant 0 : index
    %c0_23 = arith.constant 0 : index
    %34 = vector.load %arg7[%c0_22, %c0_23] : memref<1x4xf32, #tpu.memory_space<vmem>>, vector<1x4xf32>
    %35 = vector.broadcast %34 : vector<1x4xf32> to vector<16x4xf32>
    %36 = arith.addf %33, %35 : vector<16x4xf32>
    %37 = arith.negf %36 : vector<16x4xf32>
    %38 = math.exp %37 : vector<16x4xf32>
    %cst_24 = arith.constant 1.000000e+00 : f32
    %39 = vector.broadcast %cst_24 : f32 to vector<16x4xf32>
    %40 = arith.addf %39, %38 : vector<16x4xf32>
    %41 = arith.divf %39, %40 : vector<16x4xf32>
    %42 = vector.shape_cast %41 : vector<16x4xf32> to vector<1x16x4xf32>
    %43 = vector.shape_cast %31 : vector<1x16x4xf32> to vector<1x16x1x4xf32>
    %44 = vector.broadcast %43 : vector<1x16x1x4xf32> to vector<1x16x16x4xf32>
    %45 = arith.mulf %0, %44 : vector<1x16x16x4xf32>
    %46 = vector.shape_cast %42 : vector<1x16x4xf32> to vector<1x1x16x4xf32>
    %47 = vector.broadcast %46 : vector<1x1x16x4xf32> to vector<1x16x16x4xf32>
    %48 = arith.mulf %45, %47 : vector<1x16x16x4xf32>
    %c0_25 = arith.constant 0 : index
    %c0_26 = arith.constant 0 : index
    %c0_27 = arith.constant 0 : index
    %c0_28 = arith.constant 0 : index
    %49 = vector.load %arg8[%c0_25, %c0_26, %c0_27, %c0_28] : memref<1x16x16x4xf32, #tpu.memory_space<vmem>>, vector<1x16x16x4xf32>
    tpu.vector_store %arg8[%c0_25, %c0_26, %c0_27, %c0_28], %48 {strides = array<i32>} : memref<1x16x16x4xf32, #tpu.memory_space<vmem>>, vector<1x16x16x4xf32>,
    return
  }
  func.func @transform_0(%arg0: i32) -> (i32, i32, i32, i32) {
    %c0_i32 = arith.constant 0 : i32
    %c0_i32_0 = arith.constant 0 : i32
    %c0_i32_1 = arith.constant 0 : i32
    %c0_i32_2 = arith.constant 0 : i32
    return %arg0, %c0_i32, %c0_i32_0, %c0_i32_1 : i32, i32, i32, i32
  }
  func.func @transform_1(%arg0: i32) -> (i32, i32) {
    %c0_i32 = arith.constant 0 : i32
    %c0_i32_0 = arith.constant 0 : i32
    %c0_i32_1 = arith.constant 0 : i32
    return %c0_i32, %c0_i32_0 : i32, i32
  }
  func.func @transform_2(%arg0: i32) -> (i32, i32) {
    %c0_i32 = arith.constant 0 : i32
    %c0_i32_0 = arith.constant 0 : i32
    %c0_i32_1 = arith.constant 0 : i32
    return %c0_i32, %c0_i32_0 : i32, i32
  }
  func.func @transform_3(%arg0: i32) -> (i32, i32) {
    %c0_i32 = arith.constant 0 : i32
    %c0_i32_0 = arith.constant 0 : i32
    %c0_i32_1 = arith.constant 0 : i32
    return %c0_i32, %c0_i32_0 : i32, i32
  }
  func.func @transform_4(%arg0: i32) -> (i32, i32) {
    %c0_i32 = arith.constant 0 : i32
    %c0_i32_0 = arith.constant 0 : i32
    %c0_i32_1 = arith.constant 0 : i32
    return %c0_i32, %c0_i32_0 : i32, i32
  }
  func.func @transform_5(%arg0: i32) -> (i32, i32) {
    %c0_i32 = arith.constant 0 : i32
    %c0_i32_0 = arith.constant 0 : i32
    %c0_i32_1 = arith.constant 0 : i32
    return %c0_i32, %c0_i32_0 : i32, i32
  }
  func.func @transform_6(%arg0: i32) -> (i32, i32) {
    %c0_i32 = arith.constant 0 : i32
    %c0_i32_0 = arith.constant 0 : i32
    %c0_i32_1 = arith.constant 0 : i32
    return %c0_i32, %c0_i32_0 : i32, i32
  }
  func.func @transform_7(%arg0: i32) -> (i32, i32, i32, i32) {
    %c0_i32 = arith.constant 0 : i32
    %c0_i32_0 = arith.constant 0 : i32
    %c0_i32_1 = arith.constant 0 : i32
    %c0_i32_2 = arith.constant 0 : i32
    return %arg0, %c0_i32, %c0_i32_0, %c0_i32_1 : i32, i32, i32, i32
  }
}

</mosaic_0001>

<bundles_post_ra>
// kernel: coordinate_attention.1
= control target key start
LH: loop header
LB: loop body
LE: loop exit
PB: predicated region body
PF: predicated region fallthrough
CT: control target
= control target key end

     0   :  { %s1323_s24 = smov 0   ;;  %s1797_s0 = inlined_call_operand.vmem [shape: f32[2,16,16,4], index: 0, kind: input, shape index: {}]   ;;  %s1798_s1 = inlined_call_operand.vmem [shape: f32[4,8], index: 1, kind: input, shape index: {}]   ;;  %s1799_s2 = inlined_call_operand.vmem [shape: f32[1,8], index: 2, kind: input, shape index: {}]   ;;  %s1800_s3 = inlined_call_operand.vmem [shape: f32[8,4], index: 3, kind: input, shape index: {}]   ;;  %s1801_s4 = inlined_call_operand.vmem [shape: f32[1,4], index: 4, kind: input, shape index: {}]   ;;  %s1802_s5 = inlined_call_operand.vmem [shape: f32[8,4], index: 5, kind: input, shape index: {}]   ;;  %s1803_s6 = inlined_call_operand.vmem [shape: f32[1,4], index: 6, kind: input, shape index: {}]   ;;  %s1804_s7 = inlined_call_operand.vmem [shape: f32[2,16,16,4], index: 7, kind: output, shape index: {}]  }
   0x1 LB: > { %s1191_s25 = sadd.s32 4294967295, %s1280_s24   ;;  %p1195_p0 = scmp.ge.s32.totalorder %s1280_s24, 1  ;;  %s1280_s24 = sphi %s1323_s24, %s17_s24  }
   0x2   : > { %p237_p1 = scmp.lt.s32.totalorder %s1280_s24, 3 }
   0x4   : > { %p238_p2 = pnand %p1195_p0, %p237_p1 }
   0x6   : > { %241 = sbr.rel (%p238_p2) target bundleno = 575 (0x23f), region = 48 }
   0xd   : > { %v542_v0 = vld [vmem:[%s1798_s1] sm:$0xf]  ;;  %vm560_vm0 = vcmask 1043456   ;;  %p269_p3 = scmp.lt.s32.totalorder %s1191_s25, 1  ;;  %vm311_vm1 = vcmask 31744   ;;  %vm521_vm2 = vcmask 1041409  }
   0xe   : > { %1231 = vmatprep.subr.msk.mxu0 %vm560_vm0, %v542_v0  ;;  %vm523_vm3 = vcmask 1042434   ;;  %vm525_vm4 = vcmask 1043459   ;;  %vm527_vm5 = vcmask 1044484   ;;  %vm529_vm6 = vcmask 1045509  }
   0xf   : > { %1232 = vmatpush3.msk.msra.mxu0 %vm560_vm0, %v542_v0  ;;  %s1842_s25 = smov (!%p269_p3, %s1191_s25), 1  ;;  %vm531_vm7 = vcmask 1046534   ;;  %vm533_vm8 = vcmask 1047559   ;;  %vm665_vm9 = vcmask 64512  }
  0x10   : > { %s1218_s28 = sshll.u32 %s1842_s25, 8 }
  0x11   : > { %s1342_s8 = scalar_lea.vmem %s1797_s0, %s1218_s28  ;;  %s1700_s21 = scalar_lea.vmem %s1804_s7, %s1218_s28 }
  0x12   : > { %v1345_v1 = vld [vmem:[%s1342_s8] sm:$0xff]  ;;  %v1348_v2 = vld [vmem:[%s1342_s8 + $0x8] sm:$0xff]  ;;  %v1351_v3 = vld [vmem:[%s1342_s8 + $0x10] sm:$0xff] }
  0x13   : > { %v1354_v4 = vld [vmem:[%s1342_s8 + $0x18] sm:$0xff]  ;;  %v1357_v5 = vld [vmem:[%s1342_s8 + $0x20] sm:$0xff]  ;;  %v1360_v6 = vld [vmem:[%s1342_s8 + $0x28] sm:$0xff]  ;;  %v1364_v7 = vsel %vm311_vm1, %v1345_v1, 0.0  ;;  %v1368_v8 = vsel %vm311_vm1, %v1348_v2, 0.0  ;;  %v1372_v9 = vsel %vm311_vm1, %v1351_v3, 0.0 }
  0x14   : > { %1817 = vst [vmem:[#allocation2_spill] sm:$0xff] %v1357_v5  ;;  %1818 = vst [vmem:[#allocation3_spill] sm:$0xff] %v1360_v6  ;;  %v1375_v10 = vld [vmem:[%s1342_s8 + $0x30] sm:$0xff]  ;;  %v1378_v11 = vld [vmem:[%s1342_s8 + $0x38] sm:$0xff]  ;;  %v314_v13 = vadd.f32 %v1368_v8, %v1364_v7  ;;  %v1387_v14 = vsel %vm311_vm1, %v1354_v4, 0.0  ;;  %v1391_v15 = vsel %vm311_vm1, %v1357_v5, 0.0 }
  0x15   : > { %1819 = vst [vmem:[#allocation4_spill] sm:$0xff] %v1375_v10  ;;  %1820 = vst [vmem:[#allocation5_spill] sm:$0xff] %v1378_v11  ;;  %v1381_v12 = vld [vmem:[%s1342_s8 + $0x40] sm:$0xff]  ;;  %v1395_v16 = vsel %vm311_vm1, %v1360_v6, 0.0  ;;  %v1398_v17 = vld [vmem:[%s1342_s8 + $0x48] sm:$0xff]  ;;  %v323_v20 = vadd.f32 %v1387_v14, %v1372_v9  ;;  %v1412_v22 = vsel %vm311_vm1, %v1375_v10, 0.0 }
  0x16   : > { %1821 = vst [vmem:[#allocation6_spill] sm:$0xff] %v1381_v12  ;;  %1822 = vst [vmem:[#allocation7_spill] sm:$0xff] %v1398_v17  ;;  %v1401_v18 = vld [vmem:[%s1342_s8 + $0x50] sm:$0xff]  ;;  %v1404_v19 = vld [vmem:[%s1342_s8 + $0x58] sm:$0xff]  ;;  %v332_v21 = vadd.f32 %v1395_v16, %v1391_v15  ;;  %v1416_v23 = vsel %vm311_vm1, %v1378_v11, 0.0  ;;  %v315_v25 = vrot.slane %v314_v13, 4 }
  0x17   : > { %1823 = vst [vmem:[#allocation8_spill] sm:$0xff] %v1401_v18  ;;  %1824 = vst [vmem:[#allocation9_spill] sm:$0xff] %v1404_v19  ;;  %v1419_v24 = vld [vmem:[%s1342_s8 + $0x60] sm:$0xff]  ;;  %v341_v26 = vadd.f32 %v1416_v23, %v1412_v22  ;;  %v1425_v27 = vsel %vm311_vm1, %v1381_v12, 0.0  ;;  %v1429_v28 = vsel %vm311_vm1, %v1398_v17, 0.0  ;;  %v1432_v29 = vld [vmem:[%s1342_s8 + $0x68] sm:$0xff] }
  0x18   : > { %1825 = vst [vmem:[#allocation10_spill] sm:$0xff] %v1419_v24  ;;  %1826 = vst [vmem:[#allocation11_spill] sm:$0xff] %v1432_v29  ;;  %v1435_v30 = vld [vmem:[%s1342_s8 + $0x70] sm:$0xff]  ;;  %v324_v31 = vrot.slane %v323_v20, 4  ;;  %v333_v32 = vrot.slane %v332_v21, 4  ;;  %v350_v33 = vadd.f32 %v1429_v28, %v1425_v27  ;;  %v1441_v34 = vsel %vm311_vm1, %v1401_v18, 0.0 }
  0x19   : > { %1827 = vst [vmem:[#allocation12_spill] sm:$0xff] %v1435_v30  ;;  %v316_v35 = vadd.f32 %v315_v25, %v314_v13  ;;  %v342_v36 = vrot.slane %v341_v26, 4  ;;  %v1445_v37 = vsel %vm311_vm1, %v1404_v19, 0.0  ;;  %v1449_v38 = vsel %vm311_vm1, %v1419_v24, 0.0  ;;  %v1452_v39 = vld [vmem:[%s1342_s8 + $0x78] sm:$0xff]  ;;  %v1473_v0 = vld [vmem:[%s1342_s8 + $0x80] sm:$0xff] }
  0x1a   : > { %1828 = vst [vmem:[#allocation13_spill] sm:$0xff] %v1452_v39  ;;  %v325_v40 = vadd.f32 %v324_v31, %v323_v20  ;;  %v334_v41 = vadd.f32 %v333_v32, %v332_v21  ;;  %v351_v42 = vrot.slane %v350_v33, 4  ;;  %v359_v43 = vadd.f32 %v1445_v37, %v1441_v34  ;;  %v1479_v31 = vld [vmem:[%s1342_s8 + $0x90] sm:$0xff] }
  0x1b   : > { %v317_v44 = vrot.slane %v316_v35, 2  ;;  %v343_v45 = vadd.f32 %v342_v36, %v341_v26  ;;  %v1458_v46 = vsel %vm311_vm1, %v1432_v29, 0.0  ;;  %v1462_v47 = vsel %vm311_vm1, %v1435_v30, 0.0  ;;  %v1476_v26 = vld [vmem:[%s1342_s8 + $0x88] sm:$0xff] }
  0x1c   : > { %v326_v48 = vrot.slane %v325_v40, 2  ;;  %v335_v49 = vrot.slane %v334_v41, 2  ;;  %v352_v50 = vadd.f32 %v351_v42, %v350_v33  ;;  %v360_v51 = vrot.slane %v359_v43, 4  ;;  %v1510_v30 = vld [vmem:[%s1342_s8 + $0xa8] sm:$0xff] }
  0x1d   : > { %v318_v52 = vadd.f32 %v317_v44, %v316_v35  ;;  %v344_v53 = vrot.slane %v343_v45, 2  ;;  %v368_v54 = vadd.f32 %v1458_v46, %v1449_v38  ;;  %v1468_v55 = vsel %vm311_vm1, %v1452_v39, 0.0 }
  0x1e   : > { %v327_v56 = vadd.f32 %v326_v48, %v325_v40  ;;  %v336_v57 = vadd.f32 %v335_v49, %v334_v41  ;;  %v353_v58 = vrot.slane %v352_v50, 2  ;;  %v361_v59 = vadd.f32 %v360_v51, %v359_v43  ;;  %v1482_v40 = vld [vmem:[%s1342_s8 + $0x98] sm:$0xff] }
  0x1f   : > { %v319_v60 = vrot.slane %v318_v52, 1  ;;  %v345_v61 = vadd.f32 %v344_v53, %v343_v45  ;;  %v369_v62 = vrot.slane %v368_v54, 4  ;;  %v377_v63 = vadd.f32 %v1468_v55, %v1462_v47 }
  0x20   : > { %v328_v13 = vrot.slane %v327_v56, 1  ;;  %v337_v20 = vrot.slane %v336_v57, 1  ;;  %v354_v21 = vadd.f32 %v353_v58, %v352_v50  ;;  %v362_v25 = vrot.slane %v361_v59, 2 }
  0x21   : > { %v320_v32 = vadd.f32 %v319_v60, %v318_v52  ;;  %v346_v33 = vrot.slane %v345_v61, 1  ;;  %v370_v35 = vadd.f32 %v369_v62, %v368_v54  ;;  %v378_v36 = vrot.slane %v377_v63, 4 }
  0x22   : > { %v329_v41 = vadd.f32 %v328_v13, %v327_v56  ;;  %v338_v42 = vadd.f32 %v337_v20, %v336_v57  ;;  %v355_v43 = vrot.slane %v354_v21, 1  ;;  %v363_v44 = vadd.f32 %v362_v25, %v361_v59 }
  0x23   : > { %v347_v45 = vadd.f32 %v346_v33, %v345_v61  ;;  %v371_v48 = vrot.slane %v370_v35, 2  ;;  %v379_v49 = vadd.f32 %v378_v36, %v377_v63  ;;  %v1486_v50 = vsel %vm311_vm1, %v1473_v0, 0.0  ;;  %v1505_v33 = vld [vmem:[%s1342_s8 + $0xa0] sm:$0xff] }
  0x24   : > { %v356_v51 = vadd.f32 %v355_v43, %v354_v21  ;;  %v364_v52 = vrot.slane %v363_v44, 1  ;;  %v1490_v53 = vsel %vm311_vm1, %v1476_v26, 0.0  ;;  %v1494_v54 = vsel %vm311_vm1, %v1479_v31, 0.0 }
  0x25   : > { %v372_v56 = vadd.f32 %v371_v48, %v370_v35  ;;  %v380_v57 = vrot.slane %v379_v49, 2  ;;  %v386_v58 = vadd.f32 %v1490_v53, %v1486_v50  ;;  %v1500_v59 = vsel %vm311_vm1, %v1482_v40, 0.0 }
  0x26   : > { %v365_v60 = vadd.f32 %v364_v52, %v363_v44  ;;  %v395_v61 = vadd.f32 %v1500_v59, %v1494_v54  ;;  %v457_v62 = vmul.f32 0.0625, %v320_v32  ;;  %v458_v63 = vmul.f32 0.0625, %v329_v41 }
  0x27   : > { %v373_v13 = vrot.slane %v372_v56, 1  ;;  %v381_v20 = vadd.f32 %v380_v57, %v379_v49  ;;  %v387_v21 = vrot.slane %v386_v58, 4  ;;  %v459_v25 = vmul.f32 0.0625, %v338_v42 }
  0x28   : > { %v396_v35 = vrot.slane %v395_v61, 4  ;;  %v460_v36 = vmul.f32 0.0625, %v347_v45  ;;  %v461_v43 = vmul.f32 0.0625, %v356_v51  ;;  %v462_v48 = vmul.f32 0.0625, %v365_v60 }
  0x29   : > { %v374_v39 = vadd.f32 %v373_v13, %v372_v56  ;;  %v382_v44 = vrot.slane %v381_v20, 1  ;;  %v388_v52 = vadd.f32 %v387_v21, %v386_v58  ;;  %v473_v32 = vadd.f32 %v1372_v9, %v1364_v7 }
  0x2a   : > { %v397_v41 = vadd.f32 %v396_v35, %v395_v61  ;;  %v488_v49 = vadd.f32 %v1387_v14, %v1368_v8  ;;  %v522_v42 = vsel %vm521_vm2, %v458_v63, %v457_v62  ;;  %v1517_v45 = vsel %vm311_vm1, %v1505_v33, 0.0  ;;  %v1523_v61 = vld [vmem:[%s1342_s8 + $0xb0] sm:$0xff] }
  0x2b   : > { %v383_v51 = vadd.f32 %v382_v44, %v381_v20  ;;  %v389_v56 = vrot.slane %v388_v52, 2  ;;  %v463_v57 = vmul.f32 0.0625, %v374_v39  ;;  %v474_v58 = vadd.f32 %v473_v32, %v1391_v15  ;;  %v1534_v20 = vld [vmem:[%s1342_s8 + $0xb8] sm:$0xff]  ;;  %v1553_v32 = vld [vmem:[%s1342_s8 + $0xd0] sm:$0xff] }
  0x2c   : > { %v398_v60 = vrot.slane %v397_v41, 2  ;;  %v489_v7 = vadd.f32 %v488_v49, %v1395_v16  ;;  %v524_v9 = vsel %vm523_vm3, %v459_v25, %v522_v42  ;;  %v1527_v8 = vsel %vm311_vm1, %v1510_v30, 0.0 }
  0x2d   : > { %v390_v14 = vadd.f32 %v389_v56, %v388_v52  ;;  %v464_v62 = vmul.f32 0.0625, %v383_v51  ;;  %v475_v39 = vadd.f32 %v474_v58, %v1412_v22  ;;  %v526_v15 = vsel %vm525_vm4, %v460_v36, %v524_v9  ;;  %v1550_v52 = vld [vmem:[%s1342_s8 + $0xc8] sm:$0xff]  ;;  %v1564_v56 = vld [vmem:[%s1342_s8 + $0xd8] sm:$0xff] }
  0x2e   : > { %v399_v63 = vadd.f32 %v398_v60, %v397_v41  ;;  %v490_v16 = vadd.f32 %v489_v7, %v1416_v23  ;;  %v528_v13 = vsel %vm527_vm5, %v461_v43, %v526_v15  ;;  %v404_v21 = vadd.f32 %v1527_v8, %v1517_v45  ;;  %v1547_v43 = vld [vmem:[%s1342_s8 + $0xc0] sm:$0xff]  ;;  %v1570_v58 = vld [vmem:[%s1342_s8 + $0xe8] sm:$0xff]  ;;  %v1587_v15 = vld [vmem:[%s1342_s8 + $0xf0] sm:$0xff] }
  0x2f   : > { %v391_v25 = vrot.slane %v390_v14, 1  ;;  %v476_v35 = vadd.f32 %v475_v39, %v1425_v27  ;;  %v530_v44 = vsel %vm529_vm6, %v462_v48, %v528_v13  ;;  %v1542_v22 = vsel %vm311_vm1, %v1523_v61, 0.0 }
  0x30   : > { %v491_v23 = vadd.f32 %v490_v16, %v1429_v28  ;;  %v532_v36 = vsel %vm531_vm7, %v463_v57, %v530_v44  ;;  %v400_v27 = vrot.slane %v399_v63, 1  ;;  %v405_v41 = vrot.slane %v404_v21, 4  ;;  %v1567_v57 = vld [vmem:[%s1342_s8 + $0xe0] sm:$0xff]  ;;  %v1603_v44 = vld [vmem:[%s1342_s8 + $0xf8] sm:$0xff] }
  0x31   : > { %v477_v48 = vadd.f32 %v476_v35, %v1441_v34  ;;  %v534_v49 = vsel %vm533_vm8, %v464_v62, %v532_v36  ;;  %v392_v42 = vadd.f32 %v391_v25, %v390_v14  ;;  %v1559_v51 = vsel %vm311_vm1, %v1534_v20, 0.0 }
  0x32   : > { %v492_v28 = vadd.f32 %v491_v23, %v1445_v37  ;;  %1233 = vmatprep.mubr.msk.f32.mxu0 %vm311_vm1, %v534_v49  ;;  %v401_v60 = vadd.f32 %v400_v27, %v399_v63  ;;  %v406_v34 = vadd.f32 %v405_v41, %v404_v21  ;;  %v413_v7 = vadd.f32 %v1559_v51, %v1542_v22 }
  0x33   : > { %v478_v9 = vadd.f32 %v477_v48, %v1449_v38  ;;  %v1577_v14 = vsel %vm311_vm1, %v1547_v43, 0.0  ;;  %v421_v37 = vsel %vm311_vm1, %v1550_v52, 0.0  ;;  %v1583_v62 = vsel %vm311_vm1, %v1553_v32, 0.0 }
  0x34   : > { %v493_v39 = vadd.f32 %v492_v28, %v1458_v46  ;;  %v407_v63 = vrot.slane %v406_v34, 2  ;;  %v414_v16 = vrot.slane %v413_v7, 4  ;;  %v422_v13 = vadd.f32 %v421_v37, %v1577_v14 }
  0x35   : > { %v479_v38 = vadd.f32 %v478_v9, %v1462_v47  ;;  %v430_v21 = vsel %vm311_vm1, %v1564_v56, 0.0  ;;  %v1595_v25 = vsel %vm311_vm1, %v1567_v57, 0.0  ;;  %v1599_v35 = vsel %vm311_vm1, %v1570_v58, 0.0 }
  0x36   : > { %v494_v46 = vadd.f32 %v493_v39, %v1468_v55  ;;  %v408_v23 = vadd.f32 %v407_v63, %v406_v34  ;;  %v415_v36 = vadd.f32 %v414_v16, %v413_v7  ;;  %v423_v27 = vrot.slane %v422_v13, 4 }
  0x37   : > { %v480_v47 = vadd.f32 %v479_v38, %v1486_v50  ;;  %v431_v41 = vadd.f32 %v430_v21, %v1583_v62  ;;  %v440_v48 = vadd.f32 %v1599_v35, %v1595_v25  ;;  %v447_v49 = vsel %vm311_vm1, %v1587_v15, 0.0 }
  0x38   : > { %v495_v28 = vadd.f32 %v494_v46, %v1490_v53  ;;  %v409_v9 = vrot.slane %v408_v23, 1  ;;  %v416_v29 = vrot.slane %v415_v36, 2  ;;  %v424_v55 = vadd.f32 %v423_v27, %v422_v13 }
  0x39   : > { %v481_v39 = vadd.f32 %v480_v47, %v1494_v54  ;;  %v432_v34 = vrot.slane %v431_v41, 4  ;;  %v441_v7 = vrot.slane %v440_v48, 4  ;;  %v448_v50 = vsel %vm311_vm1, %v1603_v44, 0.0 }
  0x3a   : > { %v496_v63 = vadd.f32 %v495_v28, %v1500_v59  ;;  %v410_v16 = vadd.f32 %v409_v9, %v408_v23  ;;  %v417_v38 = vadd.f32 %v416_v29, %v415_v36  ;;  %v425_v24 = vrot.slane %v424_v55, 2 }
  0x3b   : > { %v433_v19 = vadd.f32 %v432_v34, %v431_v41  ;;  %v442_v18 = vadd.f32 %v441_v7, %v440_v48  ;;  %v449_v17 = vadd.f32 %v448_v50, %v447_v49  ;;  %v465_v12 = vmul.f32 0.0625, %v392_v42 }
  0x3c   : > { %v418_v53 = vrot.slane %v417_v38, 1  ;;  %v426_v46 = vadd.f32 %v425_v24, %v424_v55  ;;  %v466_v11 = vmul.f32 0.0625, %v401_v60  ;;  %v467_v13 = vmul.f32 0.0625, %v410_v16 }
  0x3d   : > { %v434_v27 = vrot.slane %v433_v19, 2  ;;  %v443_v54 = vrot.slane %v442_v18, 2  ;;  %v450_v47 = vrot.slane %v449_v17, 4  ;;  %v482_v10 = vadd.f32 %v481_v39, %v1517_v45 }
  0x3e   : > { %v419_v6 = vadd.f32 %v418_v53, %v417_v38  ;;  %v427_v5 = vrot.slane %v426_v46, 1  ;;  %v535_v59 = vsel %vm521_vm2, %v466_v11, %v465_v12  ;;  %v497_v29 = vadd.f32 %v496_v63, %v1527_v8 }
  0x3f   : > { %v435_v23 = vadd.f32 %v434_v27, %v433_v19  ;;  %v444_v36 = vadd.f32 %v443_v54, %v442_v18  ;;  %v451_v41 = vadd.f32 %v450_v47, %v449_v17  ;;  %v536_v42 = vsel %vm523_vm3, %v467_v13, %v535_v59 }
  0x40   : > { %v428_v48 = vadd.f32 %v427_v5, %v426_v46  ;;  %v468_v24 = vmul.f32 0.0625, %v419_v6  ;;  %v483_v60 = vadd.f32 %v482_v10, %v1542_v22  ;;  %v498_v28 = vadd.f32 %v497_v29, %v1559_v51 }
  0x41   : > { %v436_v9 = vrot.slane %v435_v23, 1  ;;  %v445_v55 = vrot.slane %v444_v36, 1  ;;  %v452_v45 = vrot.slane %v451_v41, 2 }
  0x42   : > { %v469_v39 = vmul.f32 0.0625, %v428_v48  ;;  %v537_v34 = vsel %vm525_vm4, %v468_v24, %v536_v42  ;;  %v484_v11 = vadd.f32 %v483_v60, %v1577_v14  ;;  %v499_v12 = vadd.f32 %v498_v28, %v421_v37 }
  0x43   : > { %v437_v19 = vadd.f32 %v436_v9, %v435_v23  ;;  %v446_v18 = vadd.f32 %v445_v55, %v444_v36  ;;  %v453_v17 = vadd.f32 %v452_v45, %v451_v41  ;;  %v1206_v45 = vld [vmem:[%s1801_s4] ss:$0 sm:$0xff] }
  0x44   : > { %v538_v8 = vsel %vm527_vm5, %v469_v39, %v537_v34  ;;  %v485_v5 = vadd.f32 %v484_v11, %v1583_v62  ;;  %v500_v6 = vadd.f32 %v499_v12, %v430_v21  ;;  %v657_v21 = vld [vmem:[%s1800_s3] sm:$0xff] }
  0x45   : > { %v454_v10 = vrot.slane %v453_v17, 1  ;;  %v470_v22 = vmul.f32 0.0625, %v437_v19  ;;  %v471_v51 = vmul.f32 0.0625, %v446_v18  ;;  %1239 = vmatprep.subr.mxu1 %v657_v21  ;;  %v1211_v18 = vld [vmem:[%s1803_s6] ss:$0 sm:$0xff] }
  0x46   : > { %v486_v7 = vadd.f32 %v485_v5, %v1595_v25  ;;  %v501_v63 = vadd.f32 %v500_v6, %v1599_v35  ;;  %1240 = vmatpush3.msra.mxu1 %v657_v21  ;;  %v759_v25 = vld [vmem:[%s1802_s5] sm:$0xff] }
  0x47   : > { %v455_v16 = vadd.f32 %v454_v10, %v453_v17  ;;  %v539_v38 = vsel %vm529_vm6, %v470_v22, %v538_v8  ;;  %1244 = vmatprep.subr.mxu1 %v759_v25  ;;  %v1200_v35 = vld [vmem:[%s1799_s2] ss:$0 sm:$0xff] }
  0x48   : > { %v540_v14 = vsel %vm531_vm7, %v471_v51, %v539_v38  ;;  %v487_v37 = vadd.f32 %v486_v7, %v447_v49  ;;  %v502_v53 = vadd.f32 %v501_v63, %v448_v50  ;;  %v1282_v38 = vmov 1966171168  }
  0x49   : > { %v472_v46 = vmul.f32 0.0625, %v455_v16 }
  0x4a   : > { %v503_v13 = vmul.f32 0.0625, %v487_v37  ;;  %v504_v62 = vmul.f32 0.0625, %v502_v53  ;;  %v866_v37 = vlaneseq }
  0x4b   : > { %v541_v27 = vsel %vm533_vm8, %v472_v46, %v540_v14  ;;  %v864_v14 = vunpack.c.l.s4 %v1282_v38 }
  0x4c   : > { %1234 = vmatmul.mubr.msk.f32.vlgmr.msra.gmra.mrb[0].mxu0 %vm311_vm1, %v541_v27 }
  0x4d   : > { %1236 = vmatprep.mubr.msk.f32.mxu0 %vm311_vm1, %v503_v13  ;;  %v865_v46 = vunpack.c.0.s8 %v864_v14  ;;  %v867_v13 = vshrl.u32 %v866_v37, 7 }
  0x4f   : > { %v868_v21 = vsub.s32 %v865_v46, %v867_v13 }
  0x50   : > { %1237 = vmatmul.mubr.msk.f32.gmra.mrb[2].mxu0 %vm311_vm1, %v504_v62 }
 0x11f   : > { %v1235_v49 = vpop.f32.mrb[0].mxu0 }
 0x120   : > { %v636_v50 = vadd.f32 %v1235_v49, %v1200_v35  ;;  %v630_v54 = vpop.f32.mrb[1].mxu0 }
 0x121   : > { %v631_v47 = vadd.f32 %v1200_v35, %v630_v54 }
 0x122   : > { %v650_v59 = vmax.f32 %v636_v50, 0.0 }
 0x123   : > { %v649_v29 = vmax.f32 %v631_v47, 0.0  ;;  %v1238_v23 = vpop.f32.mrb[2].mxu0 }
 0x124   : > { %v646_v36 = vadd.f32 %v1238_v23, %v1200_v35  ;;  %v640_v41 = vpop.f32.mrb[3].mxu0  ;;  %v654_v24 = vmin.f32 %v650_v59, 6.0  ;;  %v962_v59 = vsub.s32 0, %v867_v13 }
 0x125   : > { %v653_v42 = vmin.f32 %v649_v29, 6.0  ;;  %v641_v48 = vadd.f32 %v1200_v35, %v640_v41 }
 0x126   : > { %v652_v60 = vmax.f32 %v646_v36, 0.0 }
 0x127   : > { %1241 = vmatprep.mubr.msk.f32.mxu1 %vm665_vm9, %v653_v42  ;;  %v651_v28 = vmax.f32 %v641_v48, 0.0 }
 0x128   : > { %v656_v9 = vmin.f32 %v652_v60, 6.0  ;;  %1242 = vmatmul.mubr.msk.f32.vlgmr.msra.gmra.mrb[0].mxu1 %vm665_vm9, %v654_v24 }
 0x129   : > { %v655_v55 = vmin.f32 %v651_v28, 6.0  ;;  %1245 = vmatpush3.msra.mxu1 %v759_v25 }
 0x12b   : > { %1246 = vmatprep.mubr.msk.f32.mxu1 %vm665_vm9, %v655_v55 }
 0x12c   : > { %1247 = vmatmul.mubr.msk.f32.vlgmr.msra.gmra.mrb[2].mxu1 %vm665_vm9, %v656_v9 }
 0x1fb   : > { %v1243_v39 = vpop.f32.mrb[0].mxu1 }
 0x1fc   : > { %v744_v34 = vadd.f32 %v1243_v39, %v1206_v45  ;;  %v738_v11 = vpop.f32.mrb[1].mxu1 }
 0x1fd   : > { %v739_v12 = vadd.f32 %v1206_v45, %v738_v11 }
 0x1fe   : > { %v1210_v19 = vmul.f32 -1.442695, %v744_v34 }
 0x1ff   : > { %v1209_v17 = vmul.f32 -1.442695, %v739_v12  ;;  %v1248_v8 = vpop.f32.mrb[2].mxu1 }
 0x200   : > { %1258 = vpow2.f32 %v1210_v19  ;;  %v839_v5 = vpop.f32.mrb[3].mxu1  ;;  %v845_v6 = vadd.f32 %v1248_v8, %v1211_v18 }
 0x201   : > { %1260 = vpow2.f32 %v1209_v17  ;;  %v840_v10 = vadd.f32 %v1211_v18, %v839_v5 }
 0x202   : > { %v1215_v22 = vmul.f32 -1.442695, %v845_v6 }
 0x203   : > { %v1214_v51 = vmul.f32 -1.442695, %v840_v10 }
 0x204   : > { %1262 = vpow2.f32 %v1215_v22 }
 0x205   : > { %1264 = vpow2.f32 %v1214_v51 }
 0x20a   : > { %v1259_v7 = vpop.eup %1258 }
 0x20b   : > { %v1261_v63 = vpop.eup %1260  ;;  %v754_v16 = vadd.f32 1.0, %v1259_v7 }
 0x20c   : > { %v753_v53 = vadd.f32 1.0, %v1261_v63 }
 0x20d   : > { %1266 = vrcp.f32 %v754_v16 }
 0x20e   : > { %1268 = vrcp.f32 %v753_v53  ;;  %v1263_v27 = vpop.eup %1262 }
 0x20f   : > { %v1265_v62 = vpop.eup %1264  ;;  %v855_v25 = vadd.f32 1.0, %v1263_v27 }
 0x210   : > { %v854_v49 = vadd.f32 1.0, %v1265_v62 }
 0x211   : > { %1270 = vrcp.f32 %v855_v25 }
 0x212   : > { %1272 = vrcp.f32 %v854_v49 }
 0x217   : > { %v1267_v35 = vpop.eup %1266 }
 0x218   : > { %v1269_v50 = vpop.eup %1268  ;;  %v911_v54 = vcombine.high %v1267_v35, %v1267_v35  ;;  %v918_v47 = vrot.slane %v1267_v35, %v868_v21 }
 0x219   : > { %v862_v29 = vcombine.high %v1269_v50, %v1269_v50  ;;  %v869_v23 = vrot.slane %v1269_v50, %v868_v21 }
 0x21a   : > { %v925_v36 = vrot.slane %v911_v54, %v868_v21  ;;  %v926_v41 = vcombine.high %v918_v47, %v918_v47  ;;  %v934_v42 = vrot.slane %v918_v47, %v868_v21 }
 0x21b   : > { %v876_v48 = vrot.slane %v862_v29, %v868_v21  ;;  %v877_v24 = vcombine.high %v869_v23, %v869_v23  ;;  %v885_v60 = vrot.slane %v869_v23, %v868_v21 }
 0x21c   : > { %v927_v28 = vcombine.high %v925_v36, %v925_v36  ;;  %v941_v9 = vrot.slane %v925_v36, %v868_v21  ;;  %v948_v55 = vrot.slane %v926_v41, %v868_v21  ;;  %v956_v45 = vcombine.high %v934_v42, %v934_v42  ;;  %v1829_v41 = vld [vmem:[#allocation2_spill] sm:$0xff] }
 0x21d   : > { %v995_v39 = vrot.slane %v934_v42, %v962_v59  ;;  %v878_v34 = vcombine.high %v876_v48, %v876_v48  ;;  %v892_v11 = vrot.slane %v876_v48, %v868_v21  ;;  %v899_v12 = vrot.slane %v877_v24, %v868_v21  ;;  %v1830_v48 = vld [vmem:[#allocation3_spill] sm:$0xff] }
 0x21e   : > { %v955_v19 = vrot.slane %v927_v28, %v868_v21  ;;  %v957_v18 = vcombine.high %v941_v9, %v941_v9  ;;  %v958_v17 = vcombine.high %v948_v55, %v948_v55  ;;  %v999_v8 = vrot.slane %v948_v55, %v962_v59 }
 0x21f   : > { %v1003_v5 = vrot.slane %v956_v45, %v962_v59  ;;  %v1011_v6 = vrot.slane %v941_v9, %v962_v59  ;;  %v1650_v10 = vmul.f32 %v995_v39, %v1473_v0  ;;  %v1057_v22 = vmul.f32 %v995_v39, %v1476_v26  ;;  %v1832_v9 = vld [vmem:[#allocation5_spill] sm:$0xff]  ;;  %v1833_v45 = vld [vmem:[#allocation6_spill] sm:$0xff] }
 0x220   : > { %v959_v51 = vcombine.high %v955_v19, %v955_v19  ;;  %v1007_v7 = vrot.slane %v958_v17, %v962_v59  ;;  %v1015_v63 = vrot.slane %v955_v19, %v962_v59  ;;  %v1019_v16 = vrot.slane %v957_v18, %v962_v59  ;;  %v1838_v19 = vld [vmem:[#allocation11_spill] sm:$0xff]  ;;  %v1839_v17 = vld [vmem:[#allocation12_spill] sm:$0xff] }
 0x221   : > { %v1654_v38 = vmul.f32 %v999_v8, %v1479_v31  ;;  %v1059_v14 = vmul.f32 %v999_v8, %v1482_v40  ;;  %v1658_v37 = vmul.f32 %v1003_v5, %v1505_v33  ;;  %v1061_v53 = vmul.f32 %v1003_v5, %v1510_v30  ;;  %v1271_v30 = vpop.eup %1270  ;;  %v1840_v5 = vld [vmem:[#allocation13_spill] sm:$0xff] }
 0x222   : > { %v1023_v46 = vrot.slane %v959_v51, %v962_v59  ;;  %v1662_v0 = vmul.f32 %v1007_v7, %v1523_v61  ;;  %v1063_v26 = vmul.f32 %v1007_v7, %v1534_v20  ;;  %v1666_v13 = vmul.f32 %v1011_v6, %v1547_v43  ;;  %v1681_v25 = vpop.eup %1272 }
 0x223   : > { %v1065_v27 = vmul.f32 %v1011_v6, %v1550_v52  ;;  %v1670_v31 = vmul.f32 %v1015_v63, %v1553_v32  ;;  %v1067_v40 = vmul.f32 %v1015_v63, %v1564_v56  ;;  %v1674_v33 = vmul.f32 %v1019_v16, %v1567_v57 }
 0x224   : > { %v1069_v62 = vmul.f32 %v1019_v16, %v1570_v58  ;;  %v1678_v61 = vmul.f32 %v1023_v46, %v1587_v15  ;;  %v1071_v20 = vmul.f32 %v1023_v46, %v1603_v44  ;;  %v906_v43 = vrot.slane %v878_v34, %v868_v21  ;;  %v1834_v34 = vld [vmem:[#allocation7_spill] sm:$0xff] }
 0x225   : > { %v907_v52 = vcombine.high %v885_v60, %v885_v60  ;;  %v908_v35 = vcombine.high %v892_v11, %v892_v11  ;;  %v909_v32 = vcombine.high %v899_v12, %v899_v12  ;;  %v963_v49 = vrot.slane %v885_v60, %v962_v59  ;;  %v1831_v60 = vld [vmem:[#allocation4_spill] sm:$0xff] }
 0x226   : > { %v910_v50 = vcombine.high %v906_v43, %v906_v43  ;;  %v967_v56 = vrot.slane %v899_v12, %v962_v59  ;;  %v979_v54 = vrot.slane %v892_v11, %v962_v59  ;;  %v983_v57 = vrot.slane %v906_v43, %v962_v59  ;;  %v1836_v12 = vld [vmem:[#allocation9_spill] sm:$0xff] }
 0x227   : > { %v971_v47 = vrot.slane %v907_v52, %v962_v59  ;;  %v975_v29 = vrot.slane %v909_v32, %v962_v59  ;;  %v987_v58 = vrot.slane %v908_v35, %v962_v59  ;;  %v1040_v15 = vmul.f32 %v963_v49, %v1345_v1  ;;  %v1835_v1 = vld [vmem:[#allocation8_spill] sm:$0xff] }
 0x228   : > { %v991_v23 = vrot.slane %v910_v50, %v962_v59  ;;  %v1041_v44 = vmul.f32 %v963_v49, %v1348_v2  ;;  %v1042_v21 = vmul.f32 %v967_v56, %v1351_v3  ;;  %v1043_v36 = vmul.f32 %v967_v56, %v1354_v4  ;;  %v1837_v3 = vld [vmem:[#allocation10_spill] sm:$0xff] }
 0x229   : > { %v1044_v42 = vmul.f32 %v971_v47, %v1829_v41  ;;  %v1045_v24 = vmul.f32 %v971_v47, %v1830_v48  ;;  %v1046_v28 = vmul.f32 %v975_v29, %v1831_v60  ;;  %v1047_v55 = vmul.f32 %v975_v29, %v1832_v9 }
 0x22a   : > { %v1048_v39 = vmul.f32 %v979_v54, %v1833_v45  ;;  %v1049_v11 = vmul.f32 %v979_v54, %v1834_v34  ;;  %v1050_v59 = vmul.f32 %v983_v57, %v1835_v1  ;;  %v1051_v2 = vmul.f32 %v983_v57, %v1836_v12 }
 0x22b   : > { %v1052_v4 = vmul.f32 %v987_v58, %v1837_v3  ;;  %v1053_v18 = vmul.f32 %v987_v58, %v1838_v19  ;;  %v1054_v8 = vmul.f32 %v991_v23, %v1839_v17  ;;  %v1055_v6 = vmul.f32 %v991_v23, %v1840_v5 }
 0x22c   : > { %v1073_v51 = vmul.f32 %v1271_v30, %v1041_v44  ;;  %v1075_v7 = vmul.f32 %v1271_v30, %v1043_v36  ;;  %v1077_v63 = vmul.f32 %v1271_v30, %v1045_v24  ;;  %v1079_v16 = vmul.f32 %v1271_v30, %v1047_v55 }
 0x22d   : > { %v1081_v46 = vmul.f32 %v1271_v30, %v1049_v11  ;;  %v1083_v43 = vmul.f32 %v1271_v30, %v1051_v2  ;;  %v1085_v52 = vmul.f32 %v1271_v30, %v1053_v18  ;;  %v1087_v35 = vmul.f32 %v1271_v30, %v1055_v6 }
 0x22e   : > { %v1089_v32 = vmul.f32 %v1271_v30, %v1057_v22  ;;  %v1091_v49 = vmul.f32 %v1271_v30, %v1059_v14  ;;  %v1093_v50 = vmul.f32 %v1271_v30, %v1061_v53  ;;  %v1095_v56 = vmul.f32 %v1271_v30, %v1063_v26  ;;  %1105 = vst.msk [vmem:[%s1700_s21 + $0x8] sm:$0xff] %vm311_vm1, %v1073_v51 }
 0x22f   : > { %1107 = vst.msk [vmem:[%s1700_s21 + $0x18] sm:$0xff] %vm311_vm1, %v1075_v7  ;;  %1109 = vst.msk [vmem:[%s1700_s21 + $0x28] sm:$0xff] %vm311_vm1, %v1077_v63  ;;  %v1097_v54 = vmul.f32 %v1271_v30, %v1065_v27  ;;  %v1099_v57 = vmul.f32 %v1271_v30, %v1067_v40  ;;  %v1101_v22 = vmul.f32 %v1271_v30, %v1069_v62 }
 0x230   : > { %1111 = vst.msk [vmem:[%s1700_s21 + $0x38] sm:$0xff] %vm311_vm1, %v1079_v16  ;;  %v1103_v14 = vmul.f32 %v1271_v30, %v1071_v20  ;;  %1113 = vst.msk [vmem:[%s1700_s21 + $0x48] sm:$0xff] %vm311_vm1, %v1081_v46  ;;  %v1072_v53 = vmul.f32 %v1681_v25, %v1040_v15  ;;  %v1074_v26 = vmul.f32 %v1681_v25, %v1042_v21 }
 0x231   : > { %1115 = vst.msk [vmem:[%s1700_s21 + $0x58] sm:$0xff] %vm311_vm1, %v1083_v43  ;;  %1117 = vst.msk [vmem:[%s1700_s21 + $0x68] sm:$0xff] %vm311_vm1, %v1085_v52  ;;  %v1076_v27 = vmul.f32 %v1681_v25, %v1044_v42  ;;  %v1078_v40 = vmul.f32 %v1681_v25, %v1046_v28  ;;  %v1080_v30 = vmul.f32 %v1681_v25, %v1048_v39 }
 0x232   : > { %1119 = vst.msk [vmem:[%s1700_s21 + $0x78] sm:$0xff] %vm311_vm1, %v1087_v35  ;;  %1121 = vst.msk [vmem:[%s1700_s21 + $0x88] sm:$0xff] %vm311_vm1, %v1089_v32  ;;  %v1082_v62 = vmul.f32 %v1681_v25, %v1050_v59  ;;  %v1084_v20 = vmul.f32 %v1681_v25, %v1052_v4  ;;  %v1086_v47 = vmul.f32 %v1681_v25, %v1054_v8 }
 0x233   : > { %1123 = vst.msk [vmem:[%s1700_s21 + $0x98] sm:$0xff] %vm311_vm1, %v1091_v49  ;;  %1125 = vst.msk [vmem:[%s1700_s21 + $0xa8] sm:$0xff] %vm311_vm1, %v1093_v50  ;;  %v1088_v29 = vmul.f32 %v1681_v25, %v1650_v10  ;;  %v1090_v58 = vmul.f32 %v1681_v25, %v1654_v38  ;;  %v1092_v15 = vmul.f32 %v1681_v25, %v1658_v37 }
 0x234   : > { %1127 = vst.msk [vmem:[%s1700_s21 + $0xb8] sm:$0xff] %vm311_vm1, %v1095_v56  ;;  %1129 = vst.msk [vmem:[%s1700_s21 + $0xc8] sm:$0xff] %vm311_vm1, %v1097_v54  ;;  %v1094_v23 = vmul.f32 %v1681_v25, %v1662_v0  ;;  %v1096_v10 = vmul.f32 %v1681_v25, %v1666_v13  ;;  %v1098_v38 = vmul.f32 %v1681_v25, %v1670_v31 }
 0x235   : > { %1131 = vst.msk [vmem:[%s1700_s21 + $0xd8] sm:$0xff] %vm311_vm1, %v1099_v57  ;;  %1133 = vst.msk [vmem:[%s1700_s21 + $0xe8] sm:$0xff] %vm311_vm1, %v1101_v22  ;;  %v1100_v37 = vmul.f32 %v1681_v25, %v1674_v33  ;;  %v1102_v0 = vmul.f32 %v1681_v25, %v1678_v61 }
 0x236   : > { %1135 = vst.msk [vmem:[%s1700_s21 + $0xf8] sm:$0xff] %vm311_vm1, %v1103_v14  ;;  %1104 = vst.msk [vmem:[%s1700_s21] sm:$0xff] %vm311_vm1, %v1072_v53 }
 0x237   : > { %1106 = vst.msk [vmem:[%s1700_s21 + $0x10] sm:$0xff] %vm311_vm1, %v1074_v26  ;;  %1108 = vst.msk [vmem:[%s1700_s21 + $0x20] sm:$0xff] %vm311_vm1, %v1076_v27 }
 0x238   : > { %1110 = vst.msk [vmem:[%s1700_s21 + $0x30] sm:$0xff] %vm311_vm1, %v1078_v40  ;;  %1112 = vst.msk [vmem:[%s1700_s21 + $0x40] sm:$0xff] %vm311_vm1, %v1080_v30 }
 0x239   : > { %1114 = vst.msk [vmem:[%s1700_s21 + $0x50] sm:$0xff] %vm311_vm1, %v1082_v62  ;;  %1116 = vst.msk [vmem:[%s1700_s21 + $0x60] sm:$0xff] %vm311_vm1, %v1084_v20 }
 0x23a   : > { %1118 = vst.msk [vmem:[%s1700_s21 + $0x70] sm:$0xff] %vm311_vm1, %v1086_v47  ;;  %1120 = vst.msk [vmem:[%s1700_s21 + $0x80] sm:$0xff] %vm311_vm1, %v1088_v29 }
 0x23b   : > { %1122 = vst.msk [vmem:[%s1700_s21 + $0x90] sm:$0xff] %vm311_vm1, %v1090_v58  ;;  %1124 = vst.msk [vmem:[%s1700_s21 + $0xa0] sm:$0xff] %vm311_vm1, %v1092_v15 }
 0x23c   : > { %1126 = vst.msk [vmem:[%s1700_s21 + $0xb0] sm:$0xff] %vm311_vm1, %v1094_v23  ;;  %1128 = vst.msk [vmem:[%s1700_s21 + $0xc0] sm:$0xff] %vm311_vm1, %v1096_v10 }
 0x23d   : > { %1130 = vst.msk [vmem:[%s1700_s21 + $0xd0] sm:$0xff] %vm311_vm1, %v1098_v38  ;;  %1132 = vst.msk [vmem:[%s1700_s21 + $0xe0] sm:$0xff] %vm311_vm1, %v1100_v37 }
 0x23e   : > { %1134 = vst.msk [vmem:[%s1700_s21 + $0xf0] sm:$0xff] %vm311_vm1, %v1102_v0 }
 0x23f PF: > { %s17_s24 = sadd.s32 1, %s1280_s24  }
 0x240   : > { %p14_p4 = scmp.ge.s32.totalorder %s17_s24, 4  }
 0x242   :  { %16 = sbr.rel (!%p14_p4) target bundleno = 1 (0x1), region = 78 }

</bundles_post_ra>
